<compile_context>
chip_gen: v6e
topology: v6e:2x2x1
jax: 0.10.0
libtpu: 0.0.40
codegen_flags: <defaults>
</compile_context>

<pallas_src>
import jax
import jax.numpy as jnp
from jax.experimental import pallas as pl
from jax.experimental.pallas import tpu as pltpu


def _round_up(x: int, m: int) -> int:
    return ((x + m - 1) // m) * m


def actor_kernel(x_ref, w1_ref, b1_ref, w2_ref, b2_ref, w3_ref, b3_ref, o_ref):
    """One batch tile. x_ref: (input_dims, tile_b); params resident in VMEM.

    Computes softmax(W3 @ relu(W2 @ relu(W1 @ x + b1) + b2) + b3) over the
    action (sublane) axis and stores the (n_actions, tile_b) tile.
    """
    cdt = w1_ref.dtype            # bf16 if the wrapper casts params, else f32
    x = x_ref[...]                # (in_dim, tile_b), already cast in the wrapper

    h1 = jnp.dot(w1_ref[...], x, preferred_element_type=jnp.float32) + b1_ref[...]
    h1 = jnp.maximum(h1, 0.0)                                   # ReLU

    h2 = jnp.dot(w2_ref[...], h1.astype(cdt),
                 preferred_element_type=jnp.float32) + b2_ref[...]
    h2 = jnp.maximum(h2, 0.0)                                   # ReLU

    logits = jnp.dot(w3_ref[...], h2.astype(cdt),
                     preferred_element_type=jnp.float32) + b3_ref[...]

    # Numerically stable softmax over the action axis (== dim 1 of the PyTorch
    # (B, n_actions) output).  Exact divide so rows sum to 1.
    m = jnp.max(logits, axis=0, keepdims=True)
    e = jnp.exp(logits - m)
    o_ref[...] = (e / jnp.sum(e, axis=0, keepdims=True)).astype(o_ref.dtype)


def actor_forward(state, w1, b1, w2, b2, w3, b3, *, tile_b=None, param_dtype=None):
    """Fused MLP + softmax forward.

    state: (B, input_dims) f32
    wN:    (out_features, in_features)   -- native nn.Linear layout
    bN:    (out_features,) or (out_features, 1)
    Returns (B, n_actions) f32, matching torch.softmax(self.pi(x), dim=1).
    """
    B, in_dim = state.shape
    n_actions = w3.shape[0]

    b1 = jnp.asarray(b1, jnp.float32).reshape(-1, 1)
    b2 = jnp.asarray(b2, jnp.float32).reshape(-1, 1)
    b3 = jnp.asarray(b3, jnp.float32).reshape(-1, 1)

    # Optional low-precision path: cast params AND state here (not in-kernel)
    # so the HBM->VMEM state DMA is halved too.  Accumulation stays f32.
    if param_dtype is not None:
        w1, w2, w3 = (w.astype(param_dtype) for w in (w1, w2, w3))
        state = state.astype(param_dtype)

    # ---- batch tiling: batch lives on the lane axis ------------------------
    if tile_b is None:
        if B <= 256:
            tile_b = _round_up(B, 128)                       # one grid step
        else:
            tile_b = min(8192, _round_up(pl.cdiv(B, 2), 128))  # >=2 even steps
    tile_b = max(128, _round_up(tile_b, 128))

    b_pad = _round_up(B, tile_b)
    grid = (b_pad // tile_b,)

    # Batch-in-lanes: (in_dim, b_pad).  Zero-padded batch columns produce
    # finite softmax(bias) rows that are sliced off below.
    x_t = jnp.pad(state.T, ((0, 0), (0, b_pad - B)))

    def resident(arr):
        # Full-array block, constant block index -> DMA'd once, stays in VMEM.
        return pl.BlockSpec(arr.shape, lambda i: (0,) * arr.ndim)

    out = pl.pallas_call(
        actor_kernel,
        out_shape=jax.ShapeDtypeStruct((n_actions, b_pad), jnp.float32),
        grid=grid,
        in_specs=[
            pl.BlockSpec((in_dim, tile_b), lambda i: (0, i)),   # state tile
            resident(w1), resident(b1),
            resident(w2), resident(b2),
            resident(w3), resident(b3),
        ],
        out_specs=pl.BlockSpec((n_actions, tile_b), lambda i: (0, i)),
        compiler_params=pltpu.CompilerParams(
            # Batch tiles are independent -> shard across v7x's 2 TensorCores.
            dimension_semantics=("parallel",)),
    )(x_t, w1, b1, w2, b2, w3, b3)

    # Back to PyTorch's (B, n_actions); fuses with the pad above under jit.
    return out[:, :B].T


def init_linear(key, in_dim, out_dim):
    """nn.Linear-style uniform(-1/sqrt(in), 1/sqrt(in)) init, native (out, in)."""
    kw, kb = jax.random.split(key)
    bound = 1.0 / jnp.sqrt(jnp.float32(in_dim))
    w = jax.random.uniform(kw, (out_dim, in_dim), jnp.float32, -bound, bound)
    b = jax.random.uniform(kb, (out_dim,), jnp.float32, -bound, bound)
    return w, b


def _reference(state, w1, b1, w2, b2, w3, b3):
    h1 = jnp.maximum(state @ w1.T + b1, 0.0)
    h2 = jnp.maximum(h1 @ w2.T + b2, 0.0)
    return jax.nn.softmax(h2 @ w3.T + b3, axis=1)


# TODO(synk): optimizer (Adam) and checkpoint save/load are training-side
# utilities with no forward-pass Pallas equivalent; not implemented here.

if __name__ == "__main__":
    # Shapes consistent with the module's constructor:
    #   input_dims=16, fc1_dims=32, fc2_dims=32, n_actions=8, batch=2
    B, input_dims, fc1_dims, fc2_dims, n_actions = 2, 16, 32, 32, 8

    key = jax.random.PRNGKey(0)
    k_state, k1, k2, k3, k_big = jax.random.split(key, 5)

    state = jax.random.normal(k_state, (B, input_dims), jnp.float32)
    w1, b1 = init_linear(k1, input_dims, fc1_dims)
    w2, b2 = init_linear(k2, fc1_dims, fc2_dims)
    w3, b3 = init_linear(k3, fc2_dims, n_actions)

    actor = jax.jit(actor_forward, static_argnames=("tile_b", "param_dtype"))

    # --- Small batch (B=2): one 128-lane tile, single grid step. ------------
    pi = jax.block_until_ready(actor(state, w1, b1, w2, b2, w3, b3))
    ref = _reference(state, w1, b1, w2, b2, w3, b3)
    assert pi.shape == (B, n_actions)
    assert jnp.allclose(pi, ref, atol=1e-4, rtol=1e-4)
    assert jnp.allclose(jnp.sum(pi, axis=1), 1.0, atol=1e-5)

    # --- Larger batch: two even 256-row tiles (pipelined grid; both TCs on v7x).
    B_big = 512
    state_big = jax.random.normal(k_big, (B_big, input_dims), jnp.float32)
    pi_big = jax.block_until_ready(actor(state_big, w1, b1, w2, b2, w3, b3))
    ref_big = _reference(state_big, w1, b1, w2, b2, w3, b3)
    assert pi_big.shape == (B_big, n_actions)
    assert jnp.allclose(pi_big, ref_big, atol=1e-4, rtol=1e-4)
    assert jnp.allclose(jnp.sum(pi_big, axis=1), 1.0, atol=1e-5)

    print("KERNEL_OK")
</pallas_src>

<mosaic_0001>
module attributes {stable_mosaic.version = 11 : i64} {
  func.func @actor_kernel(%arg0: i32, %arg1: memref<16x128xf32, #tpu.memory_space<vmem>>, %arg2: memref<32x16xf32, #tpu.memory_space<vmem>>, %arg3: memref<32x1xf32, #tpu.memory_space<vmem>>, %arg4: memref<32x32xf32, #tpu.memory_space<vmem>>, %arg5: memref<32x1xf32, #tpu.memory_space<vmem>>, %arg6: memref<8x32xf32, #tpu.memory_space<vmem>>, %arg7: memref<8x1xf32, #tpu.memory_space<vmem>>, %arg8: memref<8x128xf32, #tpu.memory_space<vmem>>) attributes {dimension_semantics = [#tpu.dimension_semantics<parallel>], iteration_bounds = array<i64: 1>, scalar_prefetch = 0 : i64, scratch_operands = 0 : i64, tpu.core_type = #tpu.core_type<tc>, window_params = [{transform_indices = @transform_0, window_bounds = array<i64: 16, 128>}, {pipeline_mode = #tpu.pipeline_mode<synchronous>, transform_indices = @transform_1, window_bounds = array<i64: 32, 16>}, {pipeline_mode = #tpu.pipeline_mode<synchronous>, transform_indices = @transform_2, window_bounds = array<i64: 32, 1>}, {pipeline_mode = #tpu.pipeline_mode<synchronous>, transform_indices = @transform_3, window_bounds = array<i64: 32, 32>}, {pipeline_mode = #tpu.pipeline_mode<synchronous>, transform_indices = @transform_4, window_bounds = array<i64: 32, 1>}, {pipeline_mode = #tpu.pipeline_mode<synchronous>, transform_indices = @transform_5, window_bounds = array<i64: 8, 32>}, {pipeline_mode = #tpu.pipeline_mode<synchronous>, transform_indices = @transform_6, window_bounds = array<i64: 8, 1>}, {transform_indices = @transform_7, window_bounds = array<i64: 8, 128>}]} {
    %c0 = arith.constant 0 : index
    %c0_0 = arith.constant 0 : index
    %0 = vector.load %arg1[%c0, %c0_0] : memref<16x128xf32, #tpu.memory_space<vmem>>, vector<16x128xf32>
    %c0_1 = arith.constant 0 : index
    %c0_2 = arith.constant 0 : index
    %1 = vector.load %arg2[%c0_1, %c0_2] : memref<32x16xf32, #tpu.memory_space<vmem>>, vector<32x16xf32>
    %cst = arith.constant dense<0.000000e+00> : vector<32x128xf32>
    %2 = tpu.matmul %1, %0, %cst {dimension_numbers = #tpu.dot_dimension_numbers<[1], [0], [0], [1], [0, 0, 1, 1], [], []>} : vector<32x16xf32>, vector<16x128xf32>, vector<32x128xf32> -> vector<32x128xf32>
    %c0_3 = arith.constant 0 : index
    %c0_4 = arith.constant 0 : index
    %3 = vector.load %arg3[%c0_3, %c0_4] : memref<32x1xf32, #tpu.memory_space<vmem>>, vector<32x1xf32>
    %4 = vector.broadcast %3 : vector<32x1xf32> to vector<32x128xf32>
    %5 = arith.addf %2, %4 : vector<32x128xf32>
    %cst_5 = arith.constant 0.000000e+00 : f32
    %6 = vector.broadcast %cst_5 : f32 to vector<32x128xf32>
    %7 = arith.maximumf %5, %6 : vector<32x128xf32>
    %c0_6 = arith.constant 0 : index
    %c0_7 = arith.constant 0 : index
    %8 = vector.load %arg4[%c0_6, %c0_7] : memref<32x32xf32, #tpu.memory_space<vmem>>, vector<32x32xf32>
    %cst_8 = arith.constant dense<0.000000e+00> : vector<32x128xf32>
    %9 = tpu.matmul %8, %7, %cst_8 {dimension_numbers = #tpu.dot_dimension_numbers<[1], [0], [0], [1], [0, 0, 1, 1], [], []>} : vector<32x32xf32>, vector<32x128xf32>, vector<32x128xf32> -> vector<32x128xf32>
    %c0_9 = arith.constant 0 : index
    %c0_10 = arith.constant 0 : index
    %10 = vector.load %arg5[%c0_9, %c0_10] : memref<32x1xf32, #tpu.memory_space<vmem>>, vector<32x1xf32>
    %11 = vector.broadcast %10 : vector<32x1xf32> to vector<32x128xf32>
    %12 = arith.addf %9, %11 : vector<32x128xf32>
    %cst_11 = arith.constant 0.000000e+00 : f32
    %13 = vector.broadcast %cst_11 : f32 to vector<32x128xf32>
    %14 = arith.maximumf %12, %13 : vector<32x128xf32>
    %c0_12 = arith.constant 0 : index
    %c0_13 = arith.constant 0 : index
    %15 = vector.load %arg6[%c0_12, %c0_13] : memref<8x32xf32, #tpu.memory_space<vmem>>, vector<8x32xf32>
    %cst_14 = arith.constant dense<0.000000e+00> : vector<8x128xf32>
    %16 = tpu.matmul %15, %14, %cst_14 {dimension_numbers = #tpu.dot_dimension_numbers<[1], [0], [0], [1], [0, 0, 1, 1], [], []>} : vector<8x32xf32>, vector<32x128xf32>, vector<8x128xf32> -> vector<8x128xf32>
    %c0_15 = arith.constant 0 : index
    %c0_16 = arith.constant 0 : index
    %17 = vector.load %arg7[%c0_15, %c0_16] : memref<8x1xf32, #tpu.memory_space<vmem>>, vector<8x1xf32>
    %18 = vector.broadcast %17 : vector<8x1xf32> to vector<8x128xf32>
    %19 = arith.addf %16, %18 : vector<8x128xf32>
    %cst_17 = arith.constant dense<0xFF800000> : vector<128xf32>
    %20 = vector.multi_reduction <maximumf>, %19, %cst_17 [0] : vector<8x128xf32> to vector<128xf32>
    %21 = vector.shape_cast %20 : vector<128xf32> to vector<1x128xf32>
    %22 = vector.broadcast %21 : vector<1x128xf32> to vector<8x128xf32>
    %23 = arith.subf %19, %22 : vector<8x128xf32>
    %24 = math.exp %23 : vector<8x128xf32>
    %cst_18 = arith.constant dense<0.000000e+00> : vector<128xf32>
    %25 = vector.multi_reduction <add>, %24, %cst_18 [0] : vector<8x128xf32> to vector<128xf32>
    %26 = vector.shape_cast %25 : vector<128xf32> to vector<1x128xf32>
    %27 = vector.broadcast %26 : vector<1x128xf32> to vector<8x128xf32>
    %28 = arith.divf %24, %27 : vector<8x128xf32>
    %c0_19 = arith.constant 0 : index
    %c0_20 = arith.constant 0 : index
    %29 = vector.load %arg8[%c0_19, %c0_20] : memref<8x128xf32, #tpu.memory_space<vmem>>, vector<8x128xf32>
    tpu.vector_store %arg8[%c0_19, %c0_20], %28 {strides = array<i32>} : memref<8x128xf32, #tpu.memory_space<vmem>>, vector<8x128xf32>,
    return
  }
  func.func @transform_0(%arg0: i32) -> (i32, i32) {
    %c0_i32 = arith.constant 0 : i32
    %c0_i32_0 = arith.constant 0 : i32
    return %c0_i32, %arg0 : i32, i32
  }
  func.func @transform_1(%arg0: i32) -> (i32, i32) {
    %c0_i32 = arith.constant 0 : i32
    %c0_i32_0 = arith.constant 0 : i32
    %c0_i32_1 = arith.constant 0 : i32
    return %c0_i32, %c0_i32_0 : i32, i32
  }
  func.func @transform_2(%arg0: i32) -> (i32, i32) {
    %c0_i32 = arith.constant 0 : i32
    %c0_i32_0 = arith.constant 0 : i32
    %c0_i32_1 = arith.constant 0 : i32
    return %c0_i32, %c0_i32_0 : i32, i32
  }
  func.func @transform_3(%arg0: i32) -> (i32, i32) {
    %c0_i32 = arith.constant 0 : i32
    %c0_i32_0 = arith.constant 0 : i32
    %c0_i32_1 = arith.constant 0 : i32
    return %c0_i32, %c0_i32_0 : i32, i32
  }
  func.func @transform_4(%arg0: i32) -> (i32, i32) {
    %c0_i32 = arith.constant 0 : i32
    %c0_i32_0 = arith.constant 0 : i32
    %c0_i32_1 = arith.constant 0 : i32
    return %c0_i32, %c0_i32_0 : i32, i32
  }
  func.func @transform_5(%arg0: i32) -> (i32, i32) {
    %c0_i32 = arith.constant 0 : i32
    %c0_i32_0 = arith.constant 0 : i32
    %c0_i32_1 = arith.constant 0 : i32
    return %c0_i32, %c0_i32_0 : i32, i32
  }
  func.func @transform_6(%arg0: i32) -> (i32, i32) {
    %c0_i32 = arith.constant 0 : i32
    %c0_i32_0 = arith.constant 0 : i32
    %c0_i32_1 = arith.constant 0 : i32
    return %c0_i32, %c0_i32_0 : i32, i32
  }
  func.func @transform_7(%arg0: i32) -> (i32, i32) {
    %c0_i32 = arith.constant 0 : i32
    %c0_i32_0 = arith.constant 0 : i32
    return %c0_i32, %arg0 : i32, i32
  }
}

</mosaic_0001>

<bundles_post_ra>
// kernel: actor_forward.1
= control target key start
LH: loop header
LB: loop body
LE: loop exit
PB: predicated region body
PF: predicated region fallthrough
CT: control target
= control target key end

     0   :  { %vm56_vm0 = vcmask 130048   ;;  %v462_v3 = vmov 0   ;;  %vm186_vm1 = vcmask 261120   ;;  %v463_v36 = vmov 0.0   ;;  %s577_s0 = inlined_call_operand.vmem [shape: f32[16,128], index: 0, kind: input, shape index: {}]   ;;  %s578_s1 = inlined_call_operand.vmem [shape: f32[32,16], index: 1, kind: input, shape index: {}]   ;;  %s579_s2 = inlined_call_operand.vmem [shape: f32[32,1], index: 2, kind: input, shape index: {}]   ;;  %s580_s4 = inlined_call_operand.vmem [shape: f32[32,1], index: 4, kind: input, shape index: {}]   ;;  %s581_s6 = inlined_call_operand.vmem [shape: f32[8,1], index: 6, kind: input, shape index: {}]   ;;  %s582_s3 = inlined_call_operand.vmem [shape: f32[32,32], index: 3, kind: input, shape index: {}]   ;;  %s583_s5 = inlined_call_operand.vmem [shape: f32[8,32], index: 5, kind: input, shape index: {}]   ;;  %s584_s7 = inlined_call_operand.vmem [shape: f32[8,128], index: 7, kind: output, shape index: {}]  }
   0x1   :  { %v27_v0 = vld [vmem:[%s577_s0 + $0x8] sm:$0xff]  ;;  %v26_v1 = vld [vmem:[%s577_s0] sm:$0xff]  ;;  %456 = vset.pattern.permute.xlu0 %v462_v3  ;;  %457 = vset.pattern.permute.xlu1 %v462_v3  ;;  %v35_v5 = vld [vmem:[%s579_s2 + $0x18] sm:$0xff]  ;;  %vm464_vm2 = vmmov 0  }
   0x2   :  { %v28_v2 = vld [vmem:[%s578_s1] sm:$0xff]  ;;  %418 = vmatprep.subr.mxu0 %v27_v0  ;;  %v29_v4 = vld [vmem:[%s578_s1 + $0x8] sm:$0xff]  ;;  %v30_v6 = vld [vmem:[%s578_s1 + $0x10] sm:$0xff]  ;;  %53 = vperm.xlu0 %456, %v35_v5  }
   0x3   :  { %422 = vmatprep.mubr.msk.f32.mxu0 %vm56_vm0, %v28_v2  ;;  %419 = vmatpush3.msra.mxu0 %v27_v0  ;;  %v33_v7 = vld [vmem:[%s579_s2 + $0x8] sm:$0xff]  ;;  %v34_v8 = vld [vmem:[%s579_s2 + $0x10] sm:$0xff]  ;;  %v32_v9 = vld [vmem:[%s579_s2] sm:$0xff] }
   0x4   :  { %420 = vmatprep.subr.mxu0 %v26_v1  ;;  %43 = vperm.xlu1 %457, %v33_v7   ;;  %v31_v10 = vld [vmem:[%s578_s1 + $0x18] sm:$0xff]  ;;  %v164_v12 = vld [vmem:[%s580_s4 + $0x10] sm:$0xff]  ;;  %v163_v13 = vld [vmem:[%s580_s4 + $0x8] sm:$0xff] }
   0x5   :  { %421 = vmatpush3.msra.mxu0 %v26_v1  ;;  %v165_v11 = vld [vmem:[%s580_s4 + $0x18] sm:$0xff]  ;;  %v162_v14 = vld [vmem:[%s580_s4] sm:$0xff]  ;;  %v159_v33 = vld [vmem:[%s582_s3 + $0x8] sm:$0xff] }
   0x6   :  { %423 = vmatmul.mubr.msk.f32.vlgmr.msra.gmra.mxu0 %vm56_vm0, %v29_v4  ;;  %48 = vperm.xlu0 %456, %v34_v8   ;;  %v289_v15 = vld [vmem:[%s581_s6] sm:$0xff]  ;;  %v160_v34 = vld [vmem:[%s582_s3 + $0x10] sm:$0xff]  ;;  %v161_v35 = vld [vmem:[%s582_s3 + $0x18] sm:$0xff] }
   0x7   :  { %425 = vmatprep.mubr.msk.f32.mxu0 %vm56_vm0, %v30_v6  ;;  %v158_v16 = vld [vmem:[%s582_s3] sm:$0xff]  ;;  %442 = vmatprep.subr.mxu0 %v463_v36 }
   0x8   :  { %38 = vperm.xlu1 %457, %v32_v9   ;;  %436 = vmatprep.mubr.msk.f32.mxu1 %vm186_vm1, %v158_v16  ;;  %v288_v53 = vld [vmem:[%s583_s5] sm:$0xff] }
   0xa   :  { %426 = vmatmul.mubr.msk.f32.gmra.mxu0 %vm56_vm0, %v31_v10  ;;  %183 = vperm.xlu0 %456, %v165_v11  }
   0xb   :  { %450 = vmatprep.mubr.msk.f32.mxu0 %vm464_vm2, %v463_v36 }
   0xc   :  { %178 = vperm.xlu1 %457, %v164_v12  }
   0xe   :  { %173 = vperm.xlu0 %456, %v163_v13  }
  0x10   :  { %168 = vperm.xlu1 %457, %v162_v14  }
  0x12   :  { %292 = vperm.xlu0 %456, %v289_v15  }
  0x7d   :  { %v54_v17 = vpop.permute.xlu0 %53 }
  0x7f   :  { %v44_v19 = vpop.permute.xlu1 %43 }
  0x81   :  { %v49_v23 = vpop.permute.xlu0 %48 }
  0x83   :  { %v39_v28 = vpop.permute.xlu1 %38 }
  0x85   :  { %v184_v37 = vpop.permute.xlu0 %183 }
  0x87   :  { %v179_v39 = vpop.permute.xlu1 %178 }
  0x89   :  { %v174_v43 = vpop.permute.xlu0 %173 }
  0x8b   :  { %v169_v48 = vpop.permute.xlu1 %168 }
  0x8d   :  { %v293_v54 = vpop.permute.xlu0 %292 }
  0xc6   :  { %v424_v18 = vpop.f32.mrf.mxu0 }
  0xc7   :  { %v141_v25 = vadd.f32 %v424_v18, %v44_v19 }
  0xc8   :  { %v135_v20 = vpop.f32.mrf.mxu0 }
  0xc9   :  { %v136_v29 = vadd.f32 %v135_v20, %v39_v28  ;;  %v155_v31 = vmax.f32 %v141_v25, 0.0 }
  0xca   :  { %v427_v21 = vpop.f32.mrf.mxu0 }
  0xcb   :  { %v151_v22 = vadd.f32 %v427_v21, %v54_v17  ;;  %v154_v32 = vmax.f32 %v136_v29, 0.0 }
  0xcc   :  { %v145_v24 = vpop.f32.mrf.mxu0 }
  0xcd   :  { %v157_v26 = vmax.f32 %v151_v22, 0.0  ;;  %v146_v27 = vadd.f32 %v145_v24, %v49_v23 }
  0xcf   :  { %v156_v30 = vmax.f32 %v146_v27, 0.0  ;;  %428 = vmatprep.subr.mxu1 %v157_v26 }
  0xd0   :  { %429 = vmatpush3.msra.mxu1 %v157_v26 }
  0xd1   :  { %430 = vmatprep.subr.mxu1 %v156_v30 }
  0xd2   :  { %431 = vmatpush3.msra.mxu1 %v156_v30 }
  0xd3   :  { %432 = vmatprep.subr.mxu1 %v155_v31 }
  0xd4   :  { %433 = vmatpush3.msra.mxu1 %v155_v31 }
  0xd5   :  { %434 = vmatprep.subr.mxu1 %v154_v32 }
  0xd6   :  { %435 = vmatpush3.msra.mxu1 %v154_v32 }
  0xd7   :  { %437 = vmatmul.mubr.msk.f32.vlgmr.msra.gmra.mxu1 %vm186_vm1, %v159_v33 }
  0xd8   :  { %439 = vmatprep.mubr.msk.f32.mxu1 %vm186_vm1, %v160_v34 }
  0xdb   :  { %440 = vmatmul.mubr.msk.f32.gmra.mxu1 %vm186_vm1, %v161_v35 }
 0x197   :  { %v438_v38 = vpop.f32.mrf.mxu1 }
 0x198   :  { %v271_v45 = vadd.f32 %v438_v38, %v174_v43 }
 0x199   :  { %v265_v40 = vpop.f32.mrf.mxu1 }
 0x19a   :  { %v266_v49 = vadd.f32 %v265_v40, %v169_v48  ;;  %v285_v51 = vmax.f32 %v271_v45, 0.0 }
 0x19b   :  { %v441_v41 = vpop.f32.mrf.mxu1 }
 0x19c   :  { %v281_v42 = vadd.f32 %v441_v41, %v184_v37  ;;  %v284_v52 = vmax.f32 %v266_v49, 0.0 }
 0x19d   :  { %v275_v44 = vpop.f32.mrf.mxu1 }
 0x19e   :  { %v287_v46 = vmax.f32 %v281_v42, 0.0  ;;  %v276_v47 = vadd.f32 %v275_v44, %v179_v39 }
 0x1a0   :  { %v286_v50 = vmax.f32 %v276_v47, 0.0  ;;  %443 = vmatpush3.msra.mxu0 %v287_v46 }
 0x1a1   :  { %444 = vmatprep.subr.mxu0 %v463_v36 }
 0x1a2   :  { %445 = vmatpush3.msra.mxu0 %v286_v50 }
 0x1a3   :  { %446 = vmatprep.subr.mxu0 %v463_v36 }
 0x1a4   :  { %447 = vmatpush3.msra.mxu0 %v285_v51 }
 0x1a5   :  { %448 = vmatprep.subr.mxu0 %v463_v36 }
 0x1a6   :  { %449 = vmatpush3.msra.mxu0 %v284_v52 }
 0x1a7   :  { %451 = vmatmul.mubr.msk.f32.vlgmr.msra.gmra.mxu0 %vm186_vm1, %v288_v53 }
 0x267   :  { %v364_v55 = vpop.f32.mrf.mxu0 }
 0x268   :  { %v365_v56 = vadd.f32 %v364_v55, %v293_v54 }
 0x269   :  { %v452_v57 = vpop.f32.mrf.mxu0 }
 0x26a   :  { %v368_v58 = vrot.slane %v365_v56, 4 }
 0x26c   :  { %v369_v59 = vmax.f32 %v365_v56, %v368_v58 }
 0x26e   :  { %v370_v60 = vrot.slane %v369_v59, 2 }
 0x270   :  { %v371_v61 = vmax.f32 %v369_v59, %v370_v60 }
 0x272   :  { %v372_v62 = vrot.slane %v371_v61, 1 }
 0x274   :  { %v373_v63 = vmax.f32 %v371_v61, %v372_v62 }
 0x276   :  { %v374_v0 = vsub.f32 %v365_v56, %v373_v63 }
 0x278   :  { %v375_v1 = vmul.f32 1.442695, %v374_v0 }
 0x27a   :  { %458 = vpow2.f32 %v375_v1 }
 0x287   :  { %v459_v2 = vpop.eup %458 }
 0x288   :  { %v377_v3 = vrot.slane %v459_v2, 4 }
 0x28a   :  { %v378_v4 = vadd.f32 %v459_v2, %v377_v3 }
 0x28c   :  { %v379_v5 = vrot.slane %v378_v4, 2 }
 0x28e   :  { %v380_v6 = vadd.f32 %v379_v5, %v378_v4 }
 0x290   :  { %v381_v7 = vrot.slane %v380_v6, 1 }
 0x292   :  { %v382_v8 = vadd.f32 %v381_v7, %v380_v6 }
 0x294   :  { %460 = vrcp.f32 %v382_v8 }
 0x2a1   :  { %v461_v9 = vpop.eup %460 }
 0x2a2   :  { %v384_v10 = vmul.f32 %v461_v9, %v459_v2 }
 0x2a4   :  { %385 = vst [vmem:[%s584_s7] sm:$0xff] %v384_v10 }

</bundles_post_ra>
